<compile_context>
chip_gen: v7x
topology: tpu7x:2x2x1
jax: 0.10.0
libtpu: 0.0.40
codegen_flags: <defaults>
</compile_context>

<pallas_src>
import jax
import jax.numpy as jnp
import numpy as np
from jax.experimental import pallas as pl
from jax.experimental.pallas import tpu as pltpu

_LANES = 128  # 100 used lanes + 1 bias lane + 27 zero-pad lanes (one full vreg row)


def policy_kernel(x_ref, p_ref, out_ref):
    # x_ref : (TB, 128)  expanded observations; lane f = n*10+c holds x[b, n]
    # p_ref : (8, 128)   packed parameters (resident, same block every step):
    #   row 0: conv weight broadcast over lanes (cw[c] at f=n*10+c, 0 in pad lanes)
    #   row 1: conv bias  broadcast over lanes (cb[c] ...; 1.0 at bias lane 100)
    #   row 2: affine1.weight[0, :]  (+ affine1.bias[0] at lane 100)
    #   row 3: affine1.weight[1, :]  (+ affine1.bias[1] at lane 100)
    # Conv1d(1,10,1) + ReLU in the flattened lane-major layout (pure VPU work).
    y = jnp.maximum(x_ref[...] * p_ref[0:1, :] + p_ref[1:2, :], 0.0)   # (TB, 128)
    # Linear(100, 2): two broadcast-multiplies + lane reductions (VPU + XLU),
    # skipping the MXU.  Lane 100 of y is 1.0, so the bias is folded into the
    # weight rows; pad lanes (101..127) are exactly 0 on both sides.
    l0 = jnp.sum(y * p_ref[2:3, :], axis=1, keepdims=True)             # (TB, 1)
    l1 = jnp.sum(y * p_ref[3:4, :], axis=1, keepdims=True)             # (TB, 1)
    # Numerically stable softmax over the 2 classes.
    m = jnp.maximum(l0, l1)
    e0 = jnp.exp(l0 - m)
    e1 = jnp.exp(l1 - m)
    inv = 1.0 / (e0 + e1)
    out_ref[...] = jnp.concatenate([e0 * inv, e1 * inv], axis=1).astype(out_ref.dtype)


def prepare_policy_params(conv_w, conv_b, lin_w, lin_b):
    """Parameter-only layout plumbing.  Call ONCE per set of weights (hoisted
    out of the per-step path): returns a single (8, 128) f32 tile that is the
    only parameter DMA the kernel ever needs."""
    cw = jnp.asarray(conv_w, jnp.float32).reshape(10)   # Conv1d(1,10,1).weight[c,0,0]
    cb = jnp.asarray(conv_b, jnp.float32).reshape(10)   # Conv1d(1,10,1).bias[c]
    w = jnp.asarray(lin_w, jnp.float32).reshape(2, 100)  # Linear(100,2).weight (flat f=n*10+c)
    lb = jnp.asarray(lin_b, jnp.float32).reshape(2)      # Linear(100,2).bias

    cwb = jnp.tile(cw, 10)   # cwb[n*10+c] = cw[c]
    cbb = jnp.tile(cb, 10)   # cbb[n*10+c] = cb[c]

    p = jnp.zeros((8, _LANES), jnp.float32)
    p = p.at[0, :100].set(cwb)
    p = p.at[1, :100].set(cbb)
    p = p.at[1, 100].set(1.0)        # bias lane: y[:,100] = relu(0*x + 1) = 1
    p = p.at[2, :100].set(w[0])
    p = p.at[2, 100].set(lb[0])      # folded Linear bias, class 0
    p = p.at[3, :100].set(w[1])
    p = p.at[3, 100].set(lb[1])      # folded Linear bias, class 1
    return p


def policy_forward_batched(x_batch, params, *, block_b=128):
    """x_batch: (B, 10) f32 observations; params: output of prepare_policy_params.
    Returns (B, 2) softmax probabilities (row b == Policy.forward(x_batch[b]))."""
    x_batch = jnp.asarray(x_batch, jnp.float32).reshape(-1, 10)
    B = x_batch.shape[0]
    tb = min(block_b, ((B + 7) // 8) * 8)        # batch tile, multiple of 8
    Bp = ((B + tb - 1) // tb) * tb               # pad batch to a tile multiple
    if Bp != B:
        x_batch = jnp.pad(x_batch, ((0, Bp - B), (0, 0)))

    # x-dependent layout plumbing only: expand each (10,) observation into the
    # flattened conv-output layout (lane f=n*10+c -> x[n]) and pad lanes to 128.
    xb = jnp.repeat(x_batch, 10, axis=1)                       # (Bp, 100)
    xb = jnp.pad(xb, ((0, 0), (0, _LANES - 100)))              # (Bp, 128)

    out = pl.pallas_call(
        policy_kernel,
        out_shape=jax.ShapeDtypeStruct((Bp, 2), jnp.float32),
        grid_spec=pltpu.PrefetchScalarGridSpec(
            num_scalar_prefetch=0,
            grid=(Bp // tb,),
            in_specs=[
                pl.BlockSpec((tb, _LANES), lambda i: (i, 0)),   # observations
                pl.BlockSpec((8, _LANES), lambda i: (0, 0)),    # packed params (resident)
            ],
            out_specs=pl.BlockSpec((tb, 2), lambda i: (i, 0)),
        ),
        compiler_params=pltpu.CompilerParams(
            dimension_semantics=("parallel",)),                 # v7x: 2 TCs split batch
    )(xb, params)
    return out[:B]


def policy_forward(x, params):
    """Exact analogue of Policy.forward: any 10-element x -> (1, 2) probabilities."""
    return policy_forward_batched(jnp.asarray(x, jnp.float32).reshape(1, 10), params)


def policy_forward_ref(x_batch, conv_w, conv_b, lin_w, lin_b):
    """Pure-JAX reference mirroring the PyTorch module exactly (batched via vmap)."""
    def single(x):
        xv = x.reshape(10, 1, 1)
        conv = xv * conv_w.reshape(1, 10, 1) + conv_b.reshape(1, 10, 1)  # (10,10,1)
        h = jnp.maximum(conv, 0.0).reshape(1, -1)                         # (1,100)
        scores = h @ lin_w.T + lin_b                                      # (1,2)
        return jax.nn.softmax(scores, axis=1)[0]
    return jax.vmap(single)(jnp.asarray(x_batch, jnp.float32).reshape(-1, 10))


if __name__ == "__main__":
    key = jax.random.PRNGKey(0)
    k_x, k_cw, k_cb, k_w, k_b = jax.random.split(key, 5)

    B = 256                                                              # batched policy evals
    x_batch = jax.random.normal(k_x, (B, 10), dtype=jnp.float32)
    conv_w = jax.random.normal(k_cw, (10, 1, 1), dtype=jnp.float32) * 0.5  # Conv1d(1,10,1).weight
    conv_b = jax.random.normal(k_cb, (10,), dtype=jnp.float32) * 0.1       # Conv1d(1,10,1).bias
    lin_w = jax.random.normal(k_w, (2, 100), dtype=jnp.float32) * 0.1      # Linear(100,2).weight
    lin_b = jax.random.normal(k_b, (2,), dtype=jnp.float32) * 0.1          # Linear(100,2).bias

    # Parameter packing happens ONCE, outside the per-step path.
    params = jax.block_until_ready(prepare_policy_params(conv_w, conv_b, lin_w, lin_b))

    out = jax.block_until_ready(policy_forward_batched(x_batch, params))
    ref = jax.block_until_ready(policy_forward_ref(x_batch, conv_w, conv_b, lin_w, lin_b))
    assert out.shape == (B, 2)
    assert np.allclose(np.asarray(out), np.asarray(ref), rtol=1e-5, atol=1e-5)

    # Single-observation path (exact Policy.forward signature) also checks out.
    out1 = jax.block_until_ready(policy_forward(x_batch[0], params))
    assert out1.shape == (1, 2)
    assert np.allclose(np.asarray(out1)[0], np.asarray(ref)[0], rtol=1e-5, atol=1e-5)

    # TODO(synk): saved_log_probs / rewards are training-loop state, not part of forward.
    print("KERNEL_OK")
</pallas_src>

<mosaic_0001>
module attributes {stable_mosaic.version = 11 : i64} {
  func.func @policy_kernel(%arg0: i32, %arg1: memref<128x128xf32, #tpu.memory_space<vmem>>, %arg2: memref<8x128xf32, #tpu.memory_space<vmem>>, %arg3: memref<128x2xf32, #tpu.memory_space<vmem>>) attributes {dimension_semantics = [#tpu.dimension_semantics<parallel>], iteration_bounds = array<i64: 2>, scalar_prefetch = 0 : i64, scratch_operands = 0 : i64, tpu.core_type = #tpu.core_type<tc>, window_params = [{transform_indices = @transform_0, window_bounds = array<i64: 128, 128>}, {pipeline_mode = #tpu.pipeline_mode<synchronous>, transform_indices = @transform_1, window_bounds = array<i64: 8, 128>}, {transform_indices = @transform_2, window_bounds = array<i64: 128, 2>}]} {
    %c0 = arith.constant 0 : index
    %c0_0 = arith.constant 0 : index
    %0 = vector.load %arg1[%c0, %c0_0] : memref<128x128xf32, #tpu.memory_space<vmem>>, vector<128x128xf32>
    %c0_1 = arith.constant 0 : index
    %c0_2 = arith.constant 0 : index
    %1 = vector.load %arg2[%c0_1, %c0_2] : memref<8x128xf32, #tpu.memory_space<vmem>>, vector<1x128xf32>
    %2 = vector.broadcast %1 : vector<1x128xf32> to vector<128x128xf32>
    %3 = arith.mulf %0, %2 : vector<128x128xf32>
    %c1 = arith.constant 1 : index
    %c0_3 = arith.constant 0 : index
    %4 = vector.load %arg2[%c1, %c0_3] : memref<8x128xf32, #tpu.memory_space<vmem>>, vector<1x128xf32>
    %5 = vector.broadcast %4 : vector<1x128xf32> to vector<128x128xf32>
    %6 = arith.addf %3, %5 : vector<128x128xf32>
    %cst = arith.constant 0.000000e+00 : f32
    %7 = vector.broadcast %cst : f32 to vector<128x128xf32>
    %8 = arith.maximumf %6, %7 : vector<128x128xf32>
    %c2 = arith.constant 2 : index
    %c0_4 = arith.constant 0 : index
    %9 = vector.load %arg2[%c2, %c0_4] : memref<8x128xf32, #tpu.memory_space<vmem>>, vector<1x128xf32>
    %10 = vector.broadcast %9 : vector<1x128xf32> to vector<128x128xf32>
    %11 = arith.mulf %8, %10 : vector<128x128xf32>
    %cst_5 = arith.constant dense<0.000000e+00> : vector<128xf32>
    %12 = vector.multi_reduction <add>, %11, %cst_5 [1] : vector<128x128xf32> to vector<128xf32>
    %13 = vector.shape_cast %12 : vector<128xf32> to vector<128x1xf32>
    %c3 = arith.constant 3 : index
    %c0_6 = arith.constant 0 : index
    %14 = vector.load %arg2[%c3, %c0_6] : memref<8x128xf32, #tpu.memory_space<vmem>>, vector<1x128xf32>
    %15 = vector.broadcast %14 : vector<1x128xf32> to vector<128x128xf32>
    %16 = arith.mulf %8, %15 : vector<128x128xf32>
    %cst_7 = arith.constant dense<0.000000e+00> : vector<128xf32>
    %17 = vector.multi_reduction <add>, %16, %cst_7 [1] : vector<128x128xf32> to vector<128xf32>
    %18 = vector.shape_cast %17 : vector<128xf32> to vector<128x1xf32>
    %19 = arith.maximumf %13, %18 : vector<128x1xf32>
    %20 = arith.subf %13, %19 : vector<128x1xf32>
    %21 = math.exp %20 : vector<128x1xf32>
    %22 = arith.subf %18, %19 : vector<128x1xf32>
    %23 = math.exp %22 : vector<128x1xf32>
    %24 = arith.addf %21, %23 : vector<128x1xf32>
    %cst_8 = arith.constant 1.000000e+00 : f32
    %25 = vector.broadcast %cst_8 : f32 to vector<128x1xf32>
    %26 = arith.divf %25, %24 : vector<128x1xf32>
    %27 = arith.mulf %21, %26 : vector<128x1xf32>
    %28 = arith.mulf %23, %26 : vector<128x1xf32>
    %29 = tpu.concatenate %27, %28 in 1 : vector<128x1xf32>, vector<128x1xf32> -> vector<128x2xf32>
    %c0_9 = arith.constant 0 : index
    %c0_10 = arith.constant 0 : index
    %30 = vector.load %arg3[%c0_9, %c0_10] : memref<128x2xf32, #tpu.memory_space<vmem>>, vector<128x2xf32>
    tpu.vector_store %arg3[%c0_9, %c0_10], %29 {strides = array<i32>} : memref<128x2xf32, #tpu.memory_space<vmem>>, vector<128x2xf32>,
    return
  }
  func.func @transform_0(%arg0: i32) -> (i32, i32) {
    %c0_i32 = arith.constant 0 : i32
    %c0_i32_0 = arith.constant 0 : i32
    return %arg0, %c0_i32 : i32, i32
  }
  func.func @transform_1(%arg0: i32) -> (i32, i32) {
    %c0_i32 = arith.constant 0 : i32
    %c0_i32_0 = arith.constant 0 : i32
    %c0_i32_1 = arith.constant 0 : i32
    return %c0_i32, %c0_i32_0 : i32, i32
  }
  func.func @transform_2(%arg0: i32) -> (i32, i32) {
    %c0_i32 = arith.constant 0 : i32
    %c0_i32_0 = arith.constant 0 : i32
    return %arg0, %c0_i32 : i32, i32
  }
}

</mosaic_0001>

<bundles_post_ra>
// kernel: tpu_custom_call.1
= control target key start
LH: loop header
LB: loop body
LE: loop exit
PB: predicated region body
PF: predicated region fallthrough
CT: control target
= control target key end

     0   :  { %7 = vsyncpa [#allocation3], 0  ;;  %s1403_s0 = inlined_call_operand.hbm [shape: f32[256,128], index: 0, kind: input, shape index: {}]   ;;  %s1404_s1 = inlined_call_operand.hbm [shape: f32[8,128], index: 1, kind: input, shape index: {}]   ;;  %s1405_s2 = inlined_call_operand.vmem [shape: f32[256,2], index: 2, kind: output, shape index: {}]  }
   0x1   :  { %9 = vsyncpa [#allocation3 + $0x1], 0 }
   0x2   :  { %10 = vsyncpa [#allocation5], 0  ;;  %s947_s9 = smov 0   ;;  %s949_s10 = smov 0  }
   0x3   :  { %s951_s11 = smov 0   ;;  %s953_s12 = smov 0  }
   0x4 LB: > { %s662_s13 = sadd.s32 4294967295, %s926_s12   ;;  %s967_s14 = sadd.s32 1, %s926_s12   ;;  %s926_s12 = sphi %s953_s12, %s1424_s12   ;;  %s922_s11 = sphi %s951_s11, %s1423_s11   ;;  %s918_s10 = sphi %s949_s10, %s1422_s10   ;;  %s914_s9 = sphi %s947_s9, %s1421_s9  }
   0x5   : > { %s20_s15 = ssub.s32 %s926_s12, %s967_s14  ;;  %s23_s16 = sadd.s32 1, %s922_s11 }
   0x6   : > { %p21_p0 = scmp.eq.s32.totalorder %s20_s15, 0  ;;  %p30_p1 = scmp.ne.s32.totalorder %s922_s11, %s918_s10 }
   0x7   : > { %p31_p2 = scmp.eq.s32.totalorder %s926_s12, 0  ;;  %p36_p3 = scmp.ne.s32.totalorder %s918_s10, %s914_s9 }
   0x8   : > { %s977_s17 = scalar_select %p21_p0, %s922_s11, %s23_s16  }
   0x9   : > { %p979_p4 = por %p31_p2, %p30_p1  ;;  %p985_p5 = scmp.eq.s32.totalorder %s662_s13, 0 }
   0xa   : > { %p664_p6 = scmp.ge.s32.totalorder %s926_s12, 1  ;;  %p94_p7 = scmp.lt.s32.totalorder %s926_s12, 3 }
   0xb   : > { %s1412_s19 = scalar_select %p985_p5, 1, 0 }
   0xc   : > { %p993_p8 = por %p985_p5, %p36_p3  ;;  %p997_p9 = pnand %p664_p6, %p94_p7 }
   0xd   : > { %s928_s22 = smov [#allocation4]   ;;  %p697_p11 = scmp.lt.s32.totalorder %s926_s12, 2 }
   0xe   : > { %s1413_s20 = scalar_select %p993_p8, 1, 0 }
   0xf   : > { %s1414_s21 = scalar_select %p997_p9, 1, 0 }
  0x10   : > { %s107_s23 = sshll.u32 %s928_s22, 4  ;;  %p688_p10 = pneg %p997_p9  ;;  %s108_s23 = int_to_ptr.vmem [resolvable:$true] %s107_s23 }
  0x11   : > { %s118_s24 = sand.u32 1, %s922_s11   ;;  %p1013_p13 = pnand %p697_p11, %p979_p4 }
  0x12   : > { %p1007_p12 = pnand %p688_p10, %p985_p5  ;;  %s667_s27 = sshll.u32 %s118_s24, 7 }
  0x13   : > { %s1416_s26 = scalar_select %p1013_p13, 1, 0 }
  0x14   : > { %s830_s30 = scalar_lea.hbm %s1404_s1, 128  ;;  %p832_p1 = pneg %p1007_p12 }
  0x15   : > { %p831_p0 = scmp.ne.s32.totalorder %s1404_s1, %s830_s30  ;;  %p837_p4 = scmp.lt.u32.totalorder %s830_s30, %s1404_s1 }
  0x17   : > { %p833_p2 = pnand %p832_p1, %p831_p0 }
  0x19   : > { %p834_p3 = pneg %p833_p2 }
  0x1b   : > { %p839_p6 = pnand %p837_p4, %p834_p3 }
  0x1d   : > { %842 = shalt.err (!%p839_p6)
}
  0x1e   : > { %s843_s7 = scalar_lea.vmem %s108_s23, 128  ;;  %p851_p5 = scmp.lt.s32.totalorder %s108_s23, %s108_s23 }
  0x1f   : > { %p844_p7 = scmp.ne.s32.totalorder %s108_s23, %s843_s7  ;;  %p852_p8 = scmp.lt.s32.totalorder %s843_s7, %s843_s7 }
  0x21   : > { %p846_p10 = pnand %p844_p7, %p832_p1  ;;  %p853_p9 = por %p852_p8, %p851_p5 }
  0x23   : > { %p847_p11 = pneg %p846_p10 }
  0x25   : > { %p854_p13 = pnand %p853_p9, %p847_p11 }
  0x27   : > { %857 = shalt.err (!%p854_p13)
}
  0x28   : > { %691 = dma.hbm_to_vmem [thread:$0]  (!%p1007_p12), %s1404_s1, 128, %s108_s23, [#allocation5]  }
  0x29   : > { %s681_s15 = sshll.u32 %s926_s12, 11  ;;  %s122_s28 = scalar_lea.vmem [#allocation2], %s667_s27 }
  0x2a   : > { %s1037_s22 = scalar_lea.hbm %s1403_s0, %s681_s15  ;;  %s129_s29 = sshll.u32 %s122_s28, 4  ;;  %s1039_s29 = int_to_ptr.vmem [resolvable:$true] %s129_s29 }
  0x2b   : > { %s1041_s25 = scalar_lea.sflag [#allocation3], %s118_s24  ;;  %s858_s30 = scalar_lea.hbm %s1037_s22, 2048 }
  0x2c   : > { %p859_p5 = scmp.ne.s32.totalorder %s1037_s22, %s858_s30  ;;  %p1417_p8 = scmp.ne.s32.totalorder %s1416_s26, 0 }
  0x2d   : > { %s863_s4 = scalar_lea.hbm %s1403_s0, 4096  ;;  %p864_p0 = scmp.lt.u32.totalorder %s1037_s22, %s1403_s0 }
  0x2e   : > { %p860_p9 = pneg %p1417_p8  ;;  %p865_p1 = scmp.lt.u32.totalorder %s863_s4, %s858_s30 }
  0x2f   : > { %p867_p3 = scmp.lt.u32.totalorder %s858_s30, %s1037_s22 }
  0x30   : > { %p861_p12 = pnand %p860_p9, %p859_p5  ;;  %p866_p2 = por %p865_p1, %p864_p0 }
  0x32   : > { %p862_p13 = pneg %p861_p12  ;;  %p868_p4 = por %p867_p3, %p866_p2 }
  0x34   : > { %p869_p6 = pnand %p868_p4, %p862_p13 }
  0x36   : > { %872 = shalt.err (!%p869_p6)
}
  0x37   : > { %s873_s24 = scalar_lea.vmem %s1039_s29, 2048  ;;  %s929_s27 = smov [#allocation2]  }
  0x38   : > { %p874_p7 = scmp.ne.s32.totalorder %s1039_s29, %s873_s24  ;;  %s878_s7 = sshll.u32 %s929_s27, 4  ;;  %s879_s7 = int_to_ptr.vmem [resolvable:$false] %s878_s7 }
  0x39   : > { %s880_s8 = scalar_lea.vmem %s879_s7, 4096  ;;  %p881_p5 = scmp.lt.s32.totalorder %s1039_s29, %s879_s7 }
  0x3a   : > { %p876_p10 = pnand %p874_p7, %p860_p9  ;;  %p882_p12 = scmp.lt.s32.totalorder %s880_s8, %s873_s24 }
  0x3c   : > { %p877_p11 = pneg %p876_p10  ;;  %p883_p0 = por %p882_p12, %p881_p5 }
  0x3e   : > { %p884_p1 = pnand %p883_p0, %p877_p11 }
  0x40   : > { %887 = shalt.err (!%p884_p1)
}
  0x41   : > { %s930_s9 = smov 128   ;;  %s931_s15 = smov 8  }
  0x42   : > { %695 = dma.hbm_to_vmem [thread:$0]  (!%p1417_p8), %s1037_s22, 2048, %s1039_s29, %s1041_s25, %s930_s9, %s930_s9, %s931_s15  }
  0x43   : > { %p1418_p9 = scmp.ne.s32.totalorder %s1414_s21, 0 }
  0x44   : > { %s143_s16 = sand.u32 (!%p1418_p9), 1, %s918_s10   ;;  %p1419_p13 = scmp.ne.s32.totalorder (!%p1418_p9), %s1413_s20, 0 }
  0x45   : > { %141 = sbr.rel (%p1418_p9) target bundleno = 340 (0x154), region = 28  ;;  %s671_s18 = sshll.u32 (!%p1418_p9), %s143_s16, 7 }
  0x46   : > { %s144_s28 = scalar_lea.sflag (!%p1418_p9), [#allocation3], %s143_s16  ;;  %s1072_s30 = scalar_lea.vmem (!%p1418_p9), [#allocation2], %s671_s18 }
  0x4c   : > { %905 = dma.done.wait (%p1419_p13), %s144_s28, 2048  }
  0x4d   : > { %907 = vsyncadd (%p1419_p13), %s144_s28, 4294965248  ;;  %p1420_p2 = scmp.ne.s32.totalorder %s1412_s19, 0 }
  0x4f   : > { %909 = dma.done.wait (%p1420_p2), [#allocation5], 128  }
  0x50   : > { %911 = vsyncadd (%p1420_p2), [#allocation5], 4294967168  ;;  %v181_v0 = vld [vmem:[%s1072_s30 + $0x10] sm:$0xff]  ;;  %v1083_v1 = vld [vmem:[#allocation4] ss:$0 sm:$0xff]  ;;  %s1241_s19 = sshll.u32 %s662_s13, 4 }
  0x51   : > { %v1085_v2 = vld [vmem:[#allocation4 + $0x1] ss:$0 sm:$0xff]  ;;  %v202_v3 = vmul.f32 %v1083_v1, %v181_v0  ;;  %v182_v5 = vld [vmem:[%s1072_s30 + $0x18] sm:$0xff]  ;;  %v180_v8 = vld [vmem:[%s1072_s30 + $0x8] sm:$0xff]  ;;  %p174_p8 = scmp.lt.s32.totalorder %s1241_s19, 31  ;;  %vm551_vm0 = vcmask 7168  }
  0x52   : > { %v179_v4 = vld [vmem:[%s1072_s30] sm:$0xff]  ;;  %v203_v7 = vmul.f32 %v1083_v1, %v182_v5  ;;  %v184_v9 = vld [vmem:[%s1072_s30 + $0x28] sm:$0xff]  ;;  %v201_v12 = vmul.f32 %v1083_v1, %v180_v8  ;;  %v186_v15 = vld [vmem:[%s1072_s30 + $0x38] sm:$0xff]  ;;  %vm568_vm1 = vcmask 15360  }
  0x53   : > { %v200_v6 = vmul.f32 %v1083_v1, %v179_v4  ;;  %v183_v10 = vld [vmem:[%s1072_s30 + $0x20] sm:$0xff]  ;;  %v1096_v11 = vadd.f32 %v1085_v2, %v202_v3  ;;  %v205_v13 = vmul.f32 %v1083_v1, %v184_v9  ;;  %v185_v16 = vld [vmem:[%s1072_s30 + $0x30] sm:$0xff]  ;;  %v207_v23 = vmul.f32 %v1083_v1, %v186_v15  ;;  %v188_v28 = vld [vmem:[%s1072_s30 + $0x48] sm:$0xff]  ;;  %s1426_s19 = smov (!%p174_p8, %s1241_s19), 31 }
  0x54   : > { %v204_v14 = vmul.f32 %v1083_v1, %v183_v10  ;;  %v1103_v17 = vld [vmem:[#allocation4 + $0x2] ss:$0 sm:$0xff]  ;;  %v1109_v19 = vadd.f32 %v1085_v2, %v203_v7  ;;  %v1113_v21 = vadd.f32 %v1085_v2, %v201_v12  ;;  %v206_v27 = vmul.f32 %v1083_v1, %v185_v16  ;;  %v190_v41 = vld [vmem:[%s1072_s30 + $0x58] sm:$0xff]  ;;  %v189_v42 = vld [vmem:[%s1072_s30 + $0x50] sm:$0xff]  ;;  %s674_s12 = sshll.u32 %s1426_s19, 3 }
  0x55   : > { %v1106_v18 = vadd.f32 %v1085_v2, %v200_v6  ;;  %v239_v20 = vmax.f32 %v1096_v11, 0.0  ;;  %v1116_v22 = vadd.f32 %v1085_v2, %v205_v13  ;;  %v187_v31 = vld [vmem:[%s1072_s30 + $0x40] sm:$0xff]  ;;  %v1139_v35 = vadd.f32 %v1085_v2, %v207_v23  ;;  %v192_v51 = vld [vmem:[%s1072_s30 + $0x68] sm:$0xff]  ;;  %v194_v61 = vld [vmem:[%s1072_s30 + $0x78] sm:$0xff]  ;;  %s1307_s21 = scalar_lea.vmem %s1405_s2, %s674_s12 }
  0x56   : > { %v240_v25 = vmax.f32 %v1109_v19, 0.0  ;;  %v1122_v26 = vadd.f32 %v1085_v2, %v204_v14  ;;  %v238_v30 = vmax.f32 %v1113_v21, 0.0  ;;  %v209_v36 = vmul.f32 %v1083_v1, %v188_v28  ;;  %v191_v52 = vld [vmem:[%s1072_s30 + $0x60] sm:$0xff]  ;;  %v193_v62 = vld [vmem:[%s1072_s30 + $0x70] sm:$0xff] }
  0x57   : > { %v237_v24 = vmax.f32 %v1106_v18, 0.0  ;;  %v260_v29 = vmul.f32 %v1103_v17, %v239_v20  ;;  %v242_v34 = vmax.f32 %v1116_v22, 0.0  ;;  %v1147_v39 = vadd.f32 %v1085_v2, %v206_v27 }
  0x58   : > { %v261_v33 = vmul.f32 %v1103_v17, %v240_v25  ;;  %v259_v37 = vmul.f32 %v1103_v17, %v238_v30  ;;  %v241_v38 = vmax.f32 %v1122_v26, 0.0  ;;  %v208_v40 = vmul.f32 %v1083_v1, %v187_v31  ;;  %v678_v31 = vld [vmem:[#allocation4 + $0x3] ss:$0 sm:$0xff] }
  0x59   : > { %v258_v32 = vmul.f32 %v1103_v17, %v237_v24  ;;  %278 = vadd.xlane.f32.xlu1 %v260_v29  ;;  %v263_v43 = vmul.f32 %v1103_v17, %v242_v34  ;;  %v244_v44 = vmax.f32 %v1139_v35, 0.0  ;;  %v1157_v45 = vadd.f32 %v1085_v2, %v209_v36 }
  0x5a   : > { %v211_v46 = vmul.f32 %v1083_v1, %v190_v41  ;;  %v262_v47 = vmul.f32 %v1103_v17, %v241_v38  ;;  %v243_v48 = vmax.f32 %v1147_v39, 0.0  ;;  %v1165_v49 = vadd.f32 %v1085_v2, %v208_v40 }
  0x5b   : > { %274 = vadd.xlane.f32.xlu0 %v258_v32  ;;  %v210_v50 = vmul.f32 %v1083_v1, %v189_v42  ;;  %v265_v53 = vmul.f32 %v1103_v17, %v244_v44  ;;  %v246_v54 = vmax.f32 %v1157_v45, 0.0  ;;  %v213_v56 = vmul.f32 %v1083_v1, %v192_v51 }
  0x5c   : > { %v232_v55 = vadd.f32 %v1085_v2, %v211_v46  ;;  %v264_v57 = vmul.f32 %v1103_v17, %v243_v48  ;;  %v245_v58 = vmax.f32 %v1165_v49, 0.0  ;;  %v212_v60 = vmul.f32 %v1083_v1, %v191_v52 }
  0x5d   : > { %280 = vadd.xlane.f32.xlu1 %v261_v33  ;;  %v231_v59 = vadd.f32 %v1085_v2, %v210_v50  ;;  %v267_v63 = vmul.f32 %v1103_v17, %v246_v54  ;;  %v234_v3 = vadd.f32 %v1085_v2, %v213_v56  ;;  %v215_v4 = vmul.f32 %v1083_v1, %v194_v61 }
  0x5e   : > { %v248_v0 = vmax.f32 %v232_v55, 0.0  ;;  %v266_v5 = vmul.f32 %v1103_v17, %v245_v58  ;;  %v233_v7 = vadd.f32 %v1085_v2, %v212_v60  ;;  %v214_v8 = vmul.f32 %v1083_v1, %v193_v62 }
  0x5f   : > { %276 = vadd.xlane.f32.xlu0 %v259_v37  ;;  %v247_v6 = vmax.f32 %v231_v59, 0.0  ;;  %v250_v10 = vmax.f32 %v234_v3, 0.0  ;;  %v236_v12 = vadd.f32 %v1085_v2, %v215_v4  ;;  %v312_v32 = vmul.f32 %v678_v31, %v238_v30 }
  0x60   : > { %v269_v9 = vmul.f32 %v1103_v17, %v248_v0  ;;  %v249_v14 = vmax.f32 %v233_v7, 0.0  ;;  %v235_v15 = vadd.f32 %v1085_v2, %v214_v8  ;;  %v311_v2 = vmul.f32 %v678_v31, %v237_v24 }
  0x61   : > { %284 = vadd.xlane.f32.xlu1 %v263_v43  ;;  %v268_v13 = vmul.f32 %v1103_v17, %v247_v6  ;;  %v271_v16 = vmul.f32 %v1103_v17, %v250_v10  ;;  %v252_v23 = vmax.f32 %v236_v12, 0.0  ;;  %v314_v33 = vmul.f32 %v678_v31, %v240_v25 }
  0x62   : > { %v270_v27 = vmul.f32 %v1103_v17, %v249_v14  ;;  %v251_v1 = vmax.f32 %v235_v15, 0.0  ;;  %v313_v36 = vmul.f32 %v678_v31, %v239_v20  ;;  %v315_v21 = vmul.f32 %v678_v31, %v241_v38 }
  0x63   : > { %282 = vadd.xlane.f32.xlu0 %v262_v47  ;;  %v273_v28 = vmul.f32 %v1103_v17, %v252_v23  ;;  %v318_v18 = vmul.f32 %v678_v31, %v244_v44  ;;  %v317_v24 = vmul.f32 %v678_v31, %v243_v48  ;;  %v320_v19 = vmul.f32 %v678_v31, %v246_v54 }
  0x64   : > { %v272_v29 = vmul.f32 %v1103_v17, %v251_v1  ;;  %v316_v17 = vmul.f32 %v678_v31, %v242_v34  ;;  %v319_v25 = vmul.f32 %v678_v31, %v245_v58  ;;  %v322_v11 = vmul.f32 %v678_v31, %v248_v0 }
  0x65   : > { %288 = vadd.xlane.f32.xlu1 %v265_v53  ;;  %v321_v20 = vmul.f32 %v678_v31, %v247_v6  ;;  %v324_v22 = vmul.f32 %v678_v31, %v250_v10  ;;  %v323_v30 = vmul.f32 %v678_v31, %v249_v14  ;;  %v326_v26 = vmul.f32 %v678_v31, %v252_v23 }
  0x66   : > { %v325_v34 = vmul.f32 %v678_v31, %v251_v1 }
  0x67   : > { %286 = vadd.xlane.f32.xlu0 %v264_v57 }
  0x69   : > { %292 = vadd.xlane.f32.xlu1 %v267_v63 }
  0x6b   : > { %290 = vadd.xlane.f32.xlu0 %v266_v5 }
  0x6d   : > { %296 = vadd.xlane.f32.xlu1 %v269_v9 }
  0x6f   : > { %294 = vadd.xlane.f32.xlu0 %v268_v13 }
  0x71   : > { %300 = vadd.xlane.f32.xlu1 %v271_v16 }
  0x73   : > { %298 = vadd.xlane.f32.xlu0 %v270_v27 }
  0x75   : > { %304 = vadd.xlane.f32.xlu1 %v273_v28 }
  0x77   : > { %302 = vadd.xlane.f32.xlu0 %v272_v29 }
  0x79   : > { %329 = vadd.xlane.f32.xlu1 %v312_v32 }
  0x7b   : > { %327 = vadd.xlane.f32.xlu0 %v311_v2 }
  0x7d   : > { %333 = vadd.xlane.f32.xlu1 %v314_v33 }
  0x7f   : > { %331 = vadd.xlane.f32.xlu0 %v313_v36 }
  0x81   : > { %337 = vadd.xlane.f32.xlu1 %v316_v17 }
  0x83   : > { %335 = vadd.xlane.f32.xlu0 %v315_v21 }
  0x85   : > { %341 = vadd.xlane.f32.xlu1 %v318_v18 }
  0x87   : > { %339 = vadd.xlane.f32.xlu0 %v317_v24 }
  0x89   : > { %345 = vadd.xlane.f32.xlu1 %v320_v19 }
  0x8b   : > { %343 = vadd.xlane.f32.xlu0 %v319_v25 }
  0x8d   : > { %349 = vadd.xlane.f32.xlu1 %v322_v11 }
  0x8f   : > { %347 = vadd.xlane.f32.xlu0 %v321_v20 }
  0x91   : > { %353 = vadd.xlane.f32.xlu1 %v324_v22 }
  0x93   : > { %351 = vadd.xlane.f32.xlu0 %v323_v30 }
  0x95   : > { %357 = vadd.xlane.f32.xlu1 %v326_v26 }
  0x97   : > { %355 = vadd.xlane.f32.xlu0 %v325_v34 }
  0xe6   : > { %v279_v35 = vpop.xlane.xlu1 %278 }
  0xe8   : > { %v275_v37 = vpop.xlane.xlu0 %274 }
  0xea   : > { %v281_v38 = vpop.xlane.xlu1 %280 }
  0xec   : > { %v277_v39 = vpop.xlane.xlu0 %276 }
  0xee   : > { %v285_v40 = vpop.xlane.xlu1 %284 }
  0xf0   : > { %v283_v41 = vpop.xlane.xlu0 %282 }
  0xf2   : > { %v1210_v42 = vpop.xlane.xlu1 %288 }
  0xf4   : > { %v1212_v43 = vpop.xlane.xlu0 %286 }
  0xf6   : > { %v1214_v44 = vpop.xlane.xlu1 %292 }
  0xf8   : > { %v1216_v45 = vpop.xlane.xlu0 %290 }
  0xfa   : > { %v1218_v46 = vpop.xlane.xlu1 %296 }
  0xfc   : > { %v1220_v47 = vpop.xlane.xlu0 %294 }
  0xfe   : > { %v1222_v48 = vpop.xlane.xlu1 %300 }
 0x100   : > { %v1224_v49 = vpop.xlane.xlu0 %298 }
 0x102   : > { %v1226_v50 = vpop.xlane.xlu1 %304 }
 0x104   : > { %v1228_v51 = vpop.xlane.xlu0 %302 }
 0x106   : > { %v330_v52 = vpop.xlane.xlu1 %329 }
 0x107   : > { %v360_v53 = vmax.f32 %v277_v39, %v330_v52 }
 0x108   : > { %v328_v54 = vpop.xlane.xlu0 %327 }
 0x109   : > { %v359_v55 = vmax.f32 %v275_v37, %v328_v54  ;;  %v376_v56 = vsub.f32 %v277_v39, %v360_v53  ;;  %v424_v57 = vsub.f32 %v330_v52, %v360_v53 }
 0x10a   : > { %v334_v60 = vpop.xlane.xlu1 %333 }
 0x10b   : > { %v375_v58 = vsub.f32 %v275_v37, %v359_v55  ;;  %v423_v59 = vsub.f32 %v328_v54, %v359_v55  ;;  %v393_v61 = vmul.f32 1.442695, %v376_v56  ;;  %v441_v62 = vmul.f32 1.442695, %v424_v57 }
 0x10c   : > { %v362_v63 = vmax.f32 %v281_v38, %v334_v60  ;;  %v332_v0 = vpop.xlane.xlu0 %331 }
 0x10d   : > { %v391_v3 = vmul.f32 1.442695, %v375_v58  ;;  %v439_v4 = vmul.f32 1.442695, %v423_v59  ;;  %v361_v5 = vmax.f32 %v279_v35, %v332_v0  ;;  %734 = vpow2.f32 %v393_v61 }
 0x10e   : > { %v378_v6 = vsub.f32 %v281_v38, %v362_v63  ;;  %v426_v7 = vsub.f32 %v334_v60, %v362_v63  ;;  %736 = vpow2.f32 %v441_v62  ;;  %v338_v10 = vpop.xlane.xlu1 %337 }
 0x10f   : > { %v377_v8 = vsub.f32 %v279_v35, %v361_v5  ;;  %v425_v9 = vsub.f32 %v332_v0, %v361_v5  ;;  %738 = vpow2.f32 %v391_v3  ;;  %v364_v14 = vmax.f32 %v285_v40, %v338_v10 }
 0x110   : > { %v397_v12 = vmul.f32 1.442695, %v378_v6  ;;  %v445_v13 = vmul.f32 1.442695, %v426_v7  ;;  %v336_v15 = vpop.xlane.xlu0 %335  ;;  %740 = vpow2.f32 %v439_v4 }
 0x111   : > { %v395_v16 = vmul.f32 1.442695, %v377_v8  ;;  %v443_v23 = vmul.f32 1.442695, %v425_v9  ;;  %v363_v27 = vmax.f32 %v283_v41, %v336_v15  ;;  %v380_v1 = vsub.f32 %v285_v40, %v364_v14 }
 0x112   : > { %742 = vpow2.f32 %v397_v12  ;;  %v428_v28 = vsub.f32 %v338_v10, %v364_v14  ;;  %v342_v32 = vpop.xlane.xlu1 %341 }
 0x113   : > { %744 = vpow2.f32 %v445_v13  ;;  %v379_v29 = vsub.f32 %v283_v41, %v363_v27  ;;  %v427_v31 = vsub.f32 %v336_v15, %v363_v27  ;;  %v401_v2 = vmul.f32 1.442695, %v380_v1 }
 0x114   : > { %746 = vpow2.f32 %v395_v16  ;;  %v449_v33 = vmul.f32 1.442695, %v428_v28  ;;  %v366_v36 = vmax.f32 %v1210_v42, %v342_v32  ;;  %v340_v17 = vpop.xlane.xlu0 %339 }
 0x115   : > { %748 = vpow2.f32 %v443_v23  ;;  %v399_v21 = vmul.f32 1.442695, %v379_v29  ;;  %v447_v18 = vmul.f32 1.442695, %v427_v31  ;;  %v365_v24 = vmax.f32 %v1212_v43, %v340_v17 }
 0x116   : > { %750 = vpow2.f32 %v401_v2  ;;  %v382_v19 = vsub.f32 %v1210_v42, %v366_v36  ;;  %v430_v25 = vsub.f32 %v342_v32, %v366_v36  ;;  %v346_v22 = vpop.xlane.xlu1 %345 }
 0x117   : > { %752 = vpow2.f32 %v449_v33  ;;  %v381_v11 = vsub.f32 %v1212_v43, %v365_v24  ;;  %v429_v20 = vsub.f32 %v340_v17, %v365_v24  ;;  %v1234_v30 = vpop.eup %734  ;;  %v368_v35 = vmax.f32 %v1214_v44, %v346_v22 }
 0x118   : > { %754 = vpow2.f32 %v399_v21  ;;  %v405_v26 = vmul.f32 1.442695, %v382_v19  ;;  %v453_v34 = vmul.f32 1.442695, %v430_v25  ;;  %v344_v37 = vpop.xlane.xlu0 %343  ;;  %v1237_v38 = vpop.eup %736 }
 0x119   : > { %756 = vpow2.f32 %v447_v18  ;;  %v403_v39 = vmul.f32 1.442695, %v381_v11  ;;  %v367_v40 = vmax.f32 %v1216_v45, %v344_v37  ;;  %v1244_v41 = vpop.eup %738  ;;  %v472_v42 = vadd.f32 %v1237_v38, %v1234_v30 }
 0x11a   : > { %758 = vpow2.f32 %v405_v26  ;;  %v384_v43 = vsub.f32 %v1214_v44, %v368_v35  ;;  %v1249_v52 = vpop.eup %740  ;;  %v451_v53 = vmul.f32 1.442695, %v429_v20  ;;  %v432_v54 = vsub.f32 %v346_v22, %v368_v35  ;;  %v350_v55 = vpop.xlane.xlu1 %349 }
 0x11b   : > { %760 = vpow2.f32 %v453_v34  ;;  %v471_v57 = vadd.f32 %v1249_v52, %v1244_v41  ;;  %v383_v58 = vsub.f32 %v1216_v45, %v367_v40  ;;  %v370_v61 = vmax.f32 %v1218_v46, %v350_v55 }
 0x11c   : > { %v1251_v56 = vpop.eup %742  ;;  %762 = vrcp.f32 %v472_v42  ;;  %v348_v59 = vpop.xlane.xlu0 %347  ;;  %v409_v44 = vmul.f32 1.442695, %v384_v43  ;;  %v457_v45 = vmul.f32 1.442695, %v432_v54  ;;  %v431_v4 = vsub.f32 %v344_v37, %v367_v40 }
 0x11d   : > { %v1257_v60 = vpop.eup %744  ;;  %764 = vpow2.f32 %v403_v39  ;;  %v369_v0 = vmax.f32 %v1220_v47, %v348_v59  ;;  %v407_v8 = vmul.f32 1.442695, %v383_v58  ;;  %v386_v9 = vsub.f32 %v1218_v46, %v370_v61 }
 0x11e   : > { %v1260_v62 = vpop.eup %746  ;;  %766 = vrcp.f32 %v471_v57  ;;  %v474_v63 = vadd.f32 %v1257_v60, %v1251_v56  ;;  %v354_v5 = vpop.xlane.xlu1 %353  ;;  %v434_v12 = vsub.f32 %v350_v55, %v370_v61  ;;  %v455_v46 = vmul.f32 1.442695, %v431_v4 }
 0x11f   : > { %v1265_v3 = vpop.eup %748  ;;  %768 = vpow2.f32 %v451_v53  ;;  %v385_v13 = vsub.f32 %v1220_v47, %v369_v0  ;;  %v372_v14 = vmax.f32 %v1222_v48, %v354_v5  ;;  %v433_v27 = vsub.f32 %v348_v59, %v369_v0 }
 0x120   : > { %v1267_v6 = vpop.eup %750  ;;  %770 = vrcp.f32 %v474_v63  ;;  %v473_v7 = vadd.f32 %v1265_v3, %v1260_v62  ;;  %v352_v15 = vpop.xlane.xlu0 %351  ;;  %v413_v36 = vmul.f32 1.442695, %v386_v9  ;;  %v461_v17 = vmul.f32 1.442695, %v434_v12 }
 0x121   : > { %v1277_v10 = vpop.eup %752  ;;  %772 = vpow2.f32 %v409_v44  ;;  %v388_v28 = vsub.f32 %v1222_v48, %v372_v14  ;;  %v436_v32 = vsub.f32 %v354_v5, %v372_v14  ;;  %v371_v2 = vmax.f32 %v1224_v49, %v352_v15 }
 0x122   : > { %v1281_v16 = vpop.eup %754  ;;  %774 = vrcp.f32 %v473_v7  ;;  %v476_v23 = vadd.f32 %v1277_v10, %v1267_v6  ;;  %v1288_v29 = vpop.xlane.xlu1 %357  ;;  %v411_v21 = vmul.f32 1.442695, %v385_v13  ;;  %v459_v24 = vmul.f32 1.442695, %v433_v27 }
 0x123   : > { %v1285_v1 = vpop.eup %756  ;;  %776 = vpow2.f32 %v457_v45  ;;  %v374_v19 = vmax.f32 %v1226_v50, %v1288_v29  ;;  %v417_v22 = vmul.f32 1.442695, %v388_v28  ;;  %v465_v35 = vmul.f32 1.442695, %v436_v32 }
 0x124   : > { %v1290_v47 = vpop.eup %758  ;;  %778 = vrcp.f32 %v476_v23  ;;  %v475_v31 = vadd.f32 %v1285_v1, %v1281_v16  ;;  %v1311_v26 = vpop.xlane.xlu0 %355  ;;  %v387_v37 = vsub.f32 %v1224_v49, %v371_v2  ;;  %v435_v39 = vsub.f32 %v352_v15, %v371_v2 }
 0x125   : > { %v1296_v33 = vpop.eup %760  ;;  %780 = vpow2.f32 %v407_v8  ;;  %v390_v49 = vsub.f32 %v1226_v50, %v374_v19  ;;  %v373_v54 = vmax.f32 %v1228_v51, %v1311_v26  ;;  %v438_v50 = vsub.f32 %v1288_v29, %v374_v19 }
 0x126   : > { %v763_v18 = vpop.eup %762  ;;  %782 = vrcp.f32 %v475_v31  ;;  %v478_v48 = vadd.f32 %v1296_v33, %v1290_v47  ;;  %v415_v59 = vmul.f32 1.442695, %v387_v37  ;;  %v463_v44 = vmul.f32 1.442695, %v435_v39 }
 0x127   : > { %v1302_v25 = vpop.eup %764  ;;  %v520_v11 = vmul.f32 %v763_v18, %v1234_v30  ;;  %v536_v20 = vmul.f32 %v763_v18, %v1237_v38  ;;  %784 = vpow2.f32 %v455_v46  ;;  %v421_v4 = vmul.f32 1.442695, %v390_v49 }
 0x128   : > { %v767_v34 = vpop.eup %766  ;;  %786 = vrcp.f32 %v478_v48  ;;  %v389_v5 = vsub.f32 %v1228_v51, %v373_v54  ;;  %v469_v12 = vmul.f32 1.442695, %v438_v50  ;;  %v437_v13 = vsub.f32 %v1311_v26, %v373_v54 }
 0x129   : > { %v1314_v40 = vpop.eup %768  ;;  %v553_v42 = vsel %vm551_vm0, %v520_v11, %v536_v20  ;;  %v519_v30 = vmul.f32 %v767_v34, %v1244_v41  ;;  %v535_v43 = vmul.f32 %v767_v34, %v1249_v52  ;;  %788 = vpow2.f32 %v413_v36 }
 0x12a   : > { %v771_v38 = vpop.eup %770  ;;  %570 = vst.msk [vmem:[%s1307_s21 + $0x8] sm:$0xff] %vm568_vm1, %v553_v42  ;;  %v477_v53 = vadd.f32 %v1314_v40, %v1302_v25  ;;  %790 = vpow2.f32 %v461_v17  ;;  %v419_v27 = vmul.f32 1.442695, %v389_v5 }
 0x12b   : > { %v1326_v55 = vpop.eup %772  ;;  %v552_v57 = vsel %vm551_vm0, %v519_v30, %v535_v43  ;;  %v522_v41 = vmul.f32 %v771_v38, %v1251_v56  ;;  %v538_v52 = vmul.f32 %v771_v38, %v1257_v60  ;;  %792 = vpow2.f32 %v411_v21 }
 0x12c   : > { %v775_v58 = vpop.eup %774  ;;  %569 = vst.msk [vmem:[%s1307_s21] sm:$0xff] %vm568_vm1, %v552_v57  ;;  %794 = vrcp.f32 %v477_v53 }
 0x12d   : > { %v777_v61 = vpop.eup %776  ;;  %v555_v63 = vsel %vm551_vm0, %v522_v41, %v538_v52  ;;  %v521_v0 = vmul.f32 %v775_v58, %v1260_v62  ;;  %v537_v45 = vmul.f32 %v775_v58, %v1265_v3  ;;  %796 = vpow2.f32 %v459_v24 }
 0x12e   : > { %v779_v56 = vpop.eup %778  ;;  %572 = vst.msk [vmem:[%s1307_s21 + $0x18] sm:$0xff] %vm568_vm1, %v555_v63  ;;  %v480_v60 = vadd.f32 %v777_v61, %v1326_v55  ;;  %798 = vpow2.f32 %v417_v22 }
 0x12f   : > { %v781_v7 = vpop.eup %780  ;;  %v554_v8 = vsel %vm551_vm0, %v521_v0, %v537_v45  ;;  %v524_v9 = vmul.f32 %v779_v56, %v1267_v6  ;;  %v540_v62 = vmul.f32 %v779_v56, %v1277_v10  ;;  %800 = vpow2.f32 %v465_v35 }
 0x130   : > { %v783_v3 = vpop.eup %782  ;;  %571 = vst.msk [vmem:[%s1307_s21 + $0x10] sm:$0xff] %vm568_vm1, %v554_v8  ;;  %802 = vrcp.f32 %v480_v60 }
 0x131   : > { %v785_v14 = vpop.eup %784  ;;  %v557_v51 = vsel %vm551_vm0, %v524_v9, %v540_v62  ;;  %v523_v15 = vmul.f32 %v783_v3, %v1281_v16  ;;  %v539_v23 = vmul.f32 %v783_v3, %v1285_v1  ;;  %804 = vpow2.f32 %v415_v59 }
 0x132   : > { %v787_v6 = vpop.eup %786  ;;  %574 = vst.msk [vmem:[%s1307_s21 + $0x28] sm:$0xff] %vm568_vm1, %v557_v51  ;;  %v479_v10 = vadd.f32 %v785_v14, %v781_v7  ;;  %806 = vpow2.f32 %v463_v44  ;;  %v467_v16 = vmul.f32 1.442695, %v437_v13 }
 0x133   : > { %v789_v46 = vpop.eup %788  ;;  %v556_v28 = vsel %vm551_vm0, %v523_v15, %v539_v23  ;;  %v526_v29 = vmul.f32 %v787_v6, %v1290_v47  ;;  %v542_v31 = vmul.f32 %v787_v6, %v1296_v33  ;;  %808 = vpow2.f32 %v421_v4 }
 0x134   : > { %v791_v32 = vpop.eup %790  ;;  %573 = vst.msk [vmem:[%s1307_s21 + $0x20] sm:$0xff] %vm568_vm1, %v556_v28  ;;  %810 = vrcp.f32 %v479_v10 }
 0x135   : > { %v793_v1 = vpop.eup %792  ;;  %v559_v2 = vsel %vm551_vm0, %v526_v29, %v542_v31  ;;  %v482_v36 = vadd.f32 %v791_v32, %v789_v46  ;;  %812 = vpow2.f32 %v469_v12 }
 0x136   : > { %v795_v17 = vpop.eup %794  ;;  %576 = vst.msk [vmem:[%s1307_s21 + $0x38] sm:$0xff] %vm568_vm1, %v559_v2  ;;  %814 = vpow2.f32 %v419_v27 }
 0x137   : > { %v797_v21 = vpop.eup %796  ;;  %v525_v47 = vmul.f32 %v795_v17, %v1302_v25  ;;  %v541_v33 = vmul.f32 %v795_v17, %v1314_v40  ;;  %816 = vrcp.f32 %v482_v36 }
 0x138   : > { %v799_v18 = vpop.eup %798  ;;  %v481_v48 = vadd.f32 %v797_v21, %v793_v1  ;;  %818 = vpow2.f32 %v467_v16 }
 0x139   : > { %v801_v24 = vpop.eup %800  ;;  %v558_v19 = vsel %vm551_vm0, %v525_v47, %v541_v33 }
 0x13a   : > { %v803_v11 = vpop.eup %802  ;;  %575 = vst.msk [vmem:[%s1307_s21 + $0x30] sm:$0xff] %vm568_vm1, %v558_v19  ;;  %820 = vrcp.f32 %v481_v48  ;;  %v484_v20 = vadd.f32 %v801_v24, %v799_v18 }
 0x13b   : > { %v805_v22 = vpop.eup %804  ;;  %v528_v26 = vmul.f32 %v803_v11, %v1326_v55  ;;  %v544_v34 = vmul.f32 %v803_v11, %v777_v61 }
 0x13c   : > { %v807_v25 = vpop.eup %806  ;;  %822 = vrcp.f32 %v484_v20 }
 0x13d   : > { %v809_v35 = vpop.eup %808  ;;  %v561_v37 = vsel %vm551_vm0, %v528_v26, %v544_v34  ;;  %v483_v39 = vadd.f32 %v807_v25, %v805_v22 }
 0x13e   : > { %v811_v40 = vpop.eup %810  ;;  %578 = vst.msk [vmem:[%s1307_s21 + $0x48] sm:$0xff] %vm568_vm1, %v561_v37 }
 0x13f   : > { %v813_v42 = vpop.eup %812  ;;  %v527_v30 = vmul.f32 %v811_v40, %v781_v7  ;;  %v543_v43 = vmul.f32 %v811_v40, %v785_v14  ;;  %824 = vrcp.f32 %v483_v39 }
 0x140   : > { %v815_v38 = vpop.eup %814  ;;  %v486_v53 = vadd.f32 %v813_v42, %v809_v35 }
 0x141   : > { %v817_v49 = vpop.eup %816  ;;  %v560_v54 = vsel %vm551_vm0, %v527_v30, %v543_v43 }
 0x142   : > { %v819_v55 = vpop.eup %818  ;;  %577 = vst.msk [vmem:[%s1307_s21 + $0x40] sm:$0xff] %vm568_vm1, %v560_v54  ;;  %v530_v57 = vmul.f32 %v817_v49, %v789_v46  ;;  %v546_v41 = vmul.f32 %v817_v49, %v791_v32  ;;  %826 = vrcp.f32 %v486_v53 }
 0x143   : > { %v485_v52 = vadd.f32 %v819_v55, %v815_v38 }
 0x144   : > { %v821_v58 = vpop.eup %820  ;;  %v563_v59 = vsel %vm551_vm0, %v530_v57, %v546_v41 }
 0x145   : > { %580 = vst.msk [vmem:[%s1307_s21 + $0x58] sm:$0xff] %vm568_vm1, %v563_v59  ;;  %v529_v44 = vmul.f32 %v821_v58, %v793_v1  ;;  %v545_v50 = vmul.f32 %v821_v58, %v797_v21  ;;  %828 = vrcp.f32 %v485_v52 }
 0x146   : > { %v823_v61 = vpop.eup %822 }
 0x147   : > { %v562_v63 = vsel %vm551_vm0, %v529_v44, %v545_v50  ;;  %v532_v0 = vmul.f32 %v823_v61, %v799_v18  ;;  %v548_v45 = vmul.f32 %v823_v61, %v801_v24 }
 0x148   : > { %579 = vst.msk [vmem:[%s1307_s21 + $0x50] sm:$0xff] %vm568_vm1, %v562_v63 }
 0x149   : > { %v825_v56 = vpop.eup %824  ;;  %v565_v60 = vsel %vm551_vm0, %v532_v0, %v548_v45 }
 0x14a   : > { %582 = vst.msk [vmem:[%s1307_s21 + $0x68] sm:$0xff] %vm568_vm1, %v565_v60  ;;  %v531_v4 = vmul.f32 %v825_v56, %v805_v22  ;;  %v547_v5 = vmul.f32 %v825_v56, %v807_v25 }
 0x14c   : > { %v827_v7 = vpop.eup %826  ;;  %v564_v8 = vsel %vm551_vm0, %v531_v4, %v547_v5 }
 0x14d   : > { %581 = vst.msk [vmem:[%s1307_s21 + $0x60] sm:$0xff] %vm568_vm1, %v564_v8  ;;  %v534_v9 = vmul.f32 %v827_v7, %v809_v35  ;;  %v550_v62 = vmul.f32 %v827_v7, %v813_v42 }
 0x14f   : > { %v829_v3 = vpop.eup %828  ;;  %v567_v12 = vsel %vm551_vm0, %v534_v9, %v550_v62 }
 0x150   : > { %584 = vst.msk [vmem:[%s1307_s21 + $0x78] sm:$0xff] %vm568_vm1, %v567_v12  ;;  %v533_v13 = vmul.f32 %v829_v3, %v815_v38  ;;  %v549_v14 = vmul.f32 %v829_v3, %v819_v55 }
 0x152   : > { %v566_v51 = vsel %vm551_vm0, %v533_v13, %v549_v14 }
 0x153   : > { %583 = vst.msk [vmem:[%s1307_s21 + $0x70] sm:$0xff] %vm568_vm1, %v566_v51 }
 0x154 PF: > { %p13_p3 = scmp.ge.s32.totalorder %s967_s14, 4   ;;  %s1421_s9 = smov %s918_s10 }
 0x155   : > { %s1422_s10 = smov %s922_s11  ;;  %s1423_s11 = smov %s977_s17 }
 0x156   : > { %s1424_s12 = smov %s967_s14  ;;  %15 = sbr.rel (!%p13_p3) target bundleno = 4 (0x4), region = 72 }
 0x15d   :  { %607 = vsyncpa [#allocation3], 1 }
 0x15e   :  { %609 = vsyncpa [#allocation3 + $0x1], 1 }
 0x15f   :  { %610 = vsyncpa [#allocation5], 1 }

</bundles_post_ra>
